<compile_context>
chip_gen: v6e
topology: v6e:2x2x1
jax: 0.10.0
libtpu: 0.0.40
codegen_flags: <defaults>
</compile_context>

<pallas_src>
import functools

import jax
import jax.numpy as jnp
from jax.experimental import pallas as pl
from jax.experimental.pallas import tpu as pltpu


def covid_lstm_kernel(x_ref, wslab_ref, misc_ref, y_ref):
    """Whole forward pass resident in VMEM / vregs (shapes are tiny).

    x_ref    : (T, B, FP)      f32, features zero-padded to FP (multiple of 8)
    wslab_ref: (FP + 3H, 4H)   f32, rows = [wih0 (padded to FP) | whh0 | wih1 | whh1]
    misc_ref : (4, 4H)         f32, rows = [b0, b1, wlin (zero-padded), blin (bcast)]
    y_ref    : (T, 1)          f32 output
    """
    T, B, FP = x_ref.shape
    H = wslab_ref.shape[1] // 4

    # Static, 8-sublane-aligned slices of the packed weight slab.
    wih0 = wslab_ref[0:FP, :]                       # (FP, 4H)
    whh0 = wslab_ref[FP:FP + H, :]                  # (H, 4H)
    wih1 = wslab_ref[FP + H:FP + 2 * H, :]          # (H, 4H)
    whh1 = wslab_ref[FP + 2 * H:FP + 3 * H, :]      # (H, 4H)
    b0 = misc_ref[0:1, :]                           # (1, 4H)
    b1 = misc_ref[1:2, :]                           # (1, 4H)

    def cell_step(proj_t, h, c, whh):
        # Only the recurrent matmul sits on the serial dependent chain.
        gates = proj_t + jnp.dot(h, whh, preferred_element_type=jnp.float32)  # (B, 4H)
        sig = jax.nn.sigmoid(gates)   # one full-vreg EUP pass (i, f, o gates)
        th = jnp.tanh(gates)          # one full-vreg EUP pass (g gate)
        i = sig[:, 0 * H:1 * H]
        f = sig[:, 1 * H:2 * H]
        g = th[:, 2 * H:3 * H]
        o = sig[:, 3 * H:4 * H]
        c = f * c + i * g
        h = o * jnp.tanh(c)
        return h, c

    # ---- Layer 0 ----
    # Hoisted input projection: T independent matmuls, off the recurrence chain.
    xproj = [jnp.dot(x_ref[t], wih0, preferred_element_type=jnp.float32) + b0
             for t in range(T)]
    h = jnp.zeros((B, H), jnp.float32)
    c = jnp.zeros((B, H), jnp.float32)
    h0 = []
    for t in range(T):                 # T is a small compile-time constant -> unrolled
        h, c = cell_step(xproj[t], h, c, whh0)
        h0.append(h)

    # TODO(synk): nn.LSTM inter-layer dropout(p=0.5) is training-only; eval
    # semantics (identity) are implemented here.

    # ---- Layer 1 ----
    proj1 = [jnp.dot(h0[t], wih1, preferred_element_type=jnp.float32) + b1
             for t in range(T)]
    h = jnp.zeros((B, H), jnp.float32)
    c = jnp.zeros((B, H), jnp.float32)
    for t in range(T):
        h, c = cell_step(proj1[t], h, c, whh1)

    # last_time_step = lstm_out.view(B, T, H)[-1] == last T rows of the row-major
    # (T*B, H) flattening == rows (t=T-1, b=B-T..B-1), i.e. a sublane slice of
    # layer-1's final hidden state (requires T <= B, asserted in the wrapper).
    last = h[B - T:, :]                              # (T, H)

    # Linear(H -> 1) as VPU multiply + cross-lane reduction (no 1-column MXU op).
    wlin_row = misc_ref[2:3, 0:H]                    # (1, H)
    blin = misc_ref[3:4, 0:1]                        # (1, 1)
    y_ref[...] = jnp.sum(last * wlin_row, axis=-1, keepdims=True) + blin


def covid_lstm_forward(sequences, params, *, seq_len, n_hidden):
    """Wrapper: reshape input, pack operands into 3 arrays, call the kernel."""
    N = sequences.shape[0]
    x = sequences.reshape(N, seq_len, -1).astype(jnp.float32)    # (T=N, B=seq_len, F)
    F = x.shape[-1]
    H = n_hidden
    assert N <= seq_len, "last_time_step simplification requires num_sequences <= seq_len"
    assert H % 8 == 0, "hidden size must be sublane-aligned for the packed weight slab"

    FP = pl.cdiv(F, 8) * 8
    x_pad = jnp.pad(x, ((0, 0), (0, 0), (0, FP - F)))            # (T, B, FP)

    # Packed weight slab, all sections 8-sublane aligned: [wih0 | whh0 | wih1 | whh1].
    wih0_p = jnp.zeros((FP, 4 * H), jnp.float32).at[:F, :].set(
        params["weight_ih_l0"].T.astype(jnp.float32))
    wslab = jnp.concatenate(
        [wih0_p,
         params["weight_hh_l0"].T.astype(jnp.float32),
         params["weight_ih_l1"].T.astype(jnp.float32),
         params["weight_hh_l1"].T.astype(jnp.float32)], axis=0)  # (FP + 3H, 4H)

    # Packed small operands: fused biases, linear-head weight row, linear bias.
    b0 = (params["bias_ih_l0"] + params["bias_hh_l0"]).astype(jnp.float32)
    b1 = (params["bias_ih_l1"] + params["bias_hh_l1"]).astype(jnp.float32)
    wlin_row = jnp.zeros((4 * H,), jnp.float32).at[:H].set(
        params["linear_weight"][0].astype(jnp.float32))
    blin_row = jnp.full((4 * H,), params["linear_bias"][0], jnp.float32)
    misc = jnp.stack([b0, b1, wlin_row, blin_row], axis=0)       # (4, 4H)

    vmem = pl.BlockSpec(memory_space=pltpu.MemorySpace.VMEM)
    return pl.pallas_call(
        covid_lstm_kernel,
        out_shape=jax.ShapeDtypeStruct((N, 1), jnp.float32),
        in_specs=[vmem, vmem, vmem],
        out_specs=vmem,
    )(x_pad, wslab, misc)


def _reference_forward(sequences, params, *, seq_len, n_hidden):
    """Pure-JAX reference of the same PyTorch semantics (for validation)."""
    N = sequences.shape[0]
    x = sequences.reshape(N, seq_len, -1).astype(jnp.float32)
    H = n_hidden

    def layer(xs, wih, whh, bih, bhh):
        B = xs.shape[1]
        h = jnp.zeros((B, H), jnp.float32)
        c = jnp.zeros((B, H), jnp.float32)
        outs = []
        for t in range(xs.shape[0]):
            gates = xs[t] @ wih.T + bih + h @ whh.T + bhh
            i = jax.nn.sigmoid(gates[:, 0 * H:1 * H])
            f = jax.nn.sigmoid(gates[:, 1 * H:2 * H])
            g = jnp.tanh(gates[:, 2 * H:3 * H])
            o = jax.nn.sigmoid(gates[:, 3 * H:4 * H])
            c = f * c + i * g
            h = o * jnp.tanh(c)
            outs.append(h)
        return jnp.stack(outs, axis=0)

    h0 = layer(x, params["weight_ih_l0"], params["weight_hh_l0"],
               params["bias_ih_l0"], params["bias_hh_l0"])
    h1 = layer(h0, params["weight_ih_l1"], params["weight_hh_l1"],
               params["bias_ih_l1"], params["bias_hh_l1"])
    last = h1.reshape(seq_len, N, H)[-1]
    return last @ params["linear_weight"].T + params["linear_bias"]


def init_params(key, n_features, n_hidden):
    """Deterministic params with PyTorch-like shapes and uniform(-k, k) init."""
    H = n_hidden
    k = 1.0 / jnp.sqrt(jnp.float32(H))
    shapes = {
        "weight_ih_l0": (4 * H, n_features),
        "weight_hh_l0": (4 * H, H),
        "bias_ih_l0": (4 * H,),
        "bias_hh_l0": (4 * H,),
        "weight_ih_l1": (4 * H, H),
        "weight_hh_l1": (4 * H, H),
        "bias_ih_l1": (4 * H,),
        "bias_hh_l1": (4 * H,),
        "linear_weight": (1, H),
        "linear_bias": (1,),
    }
    params = {}
    for name, shape in shapes.items():
        key, sub = jax.random.split(key)
        params[name] = jax.random.uniform(sub, shape, jnp.float32, -k, k)
    return params


if __name__ == "__main__":
    n_features = 4
    n_hidden = 32
    seq_len = 8
    num_sequences = 2   # = len(sequences); acts as LSTM time axis (batch_first=False)

    key = jax.random.PRNGKey(0)
    key, pkey, xkey = jax.random.split(key, 3)
    params = init_params(pkey, n_features, n_hidden)
    sequences = jax.random.normal(xkey, (num_sequences, seq_len, n_features), jnp.float32)

    fwd = functools.partial(covid_lstm_forward, seq_len=seq_len, n_hidden=n_hidden)
    y = jax.block_until_ready(fwd(sequences, params))

    y_ref = _reference_forward(sequences, params, seq_len=seq_len, n_hidden=n_hidden)
    assert y.shape == (num_sequences, 1)
    assert jnp.allclose(y, y_ref, rtol=1e-4, atol=1e-4), (y, y_ref)

    print("KERNEL_OK")
</pallas_src>

<mosaic_0001>
module attributes {stable_mosaic.version = 11 : i64} {
  func.func @covid_lstm_kernel(%arg0: memref<2x8x8xf32, #tpu.memory_space<vmem>>, %arg1: memref<104x128xf32, #tpu.memory_space<vmem>>, %arg2: memref<4x128xf32, #tpu.memory_space<vmem>>, %arg3: memref<2x1xf32, #tpu.memory_space<vmem>>) attributes {dimension_semantics = [], scalar_prefetch = 0 : i64, scratch_operands = 0 : i64, tpu.core_type = #tpu.core_type<tc>} {
    %c0 = arith.constant 0 : index
    %c0_0 = arith.constant 0 : index
    %0 = vector.load %arg1[%c0, %c0_0] : memref<104x128xf32, #tpu.memory_space<vmem>>, vector<8x128xf32>
    %c8 = arith.constant 8 : index
    %c0_1 = arith.constant 0 : index
    %1 = vector.load %arg1[%c8, %c0_1] : memref<104x128xf32, #tpu.memory_space<vmem>>, vector<32x128xf32>
    %c40 = arith.constant 40 : index
    %c0_2 = arith.constant 0 : index
    %2 = vector.load %arg1[%c40, %c0_2] : memref<104x128xf32, #tpu.memory_space<vmem>>, vector<32x128xf32>
    %c72 = arith.constant 72 : index
    %c0_3 = arith.constant 0 : index
    %3 = vector.load %arg1[%c72, %c0_3] : memref<104x128xf32, #tpu.memory_space<vmem>>, vector<32x128xf32>
    %c0_4 = arith.constant 0 : index
    %c0_5 = arith.constant 0 : index
    %4 = vector.load %arg2[%c0_4, %c0_5] : memref<4x128xf32, #tpu.memory_space<vmem>>, vector<1x128xf32>
    %c1 = arith.constant 1 : index
    %c0_6 = arith.constant 0 : index
    %5 = vector.load %arg2[%c1, %c0_6] : memref<4x128xf32, #tpu.memory_space<vmem>>, vector<1x128xf32>
    %c0_7 = arith.constant 0 : index
    %c0_8 = arith.constant 0 : index
    %c0_9 = arith.constant 0 : index
    %6 = vector.load %arg0[%c0_7, %c0_8, %c0_9] : memref<2x8x8xf32, #tpu.memory_space<vmem>>, vector<1x8x8xf32>
    %7 = vector.shape_cast %6 : vector<1x8x8xf32> to vector<8x8xf32>
    %cst = arith.constant dense<0.000000e+00> : vector<8x128xf32>
    %8 = tpu.matmul %7, %0, %cst {dimension_numbers = #tpu.dot_dimension_numbers<[1], [0], [0], [1], [0, 0, 1, 1], [], []>} : vector<8x8xf32>, vector<8x128xf32>, vector<8x128xf32> -> vector<8x128xf32>
    %9 = vector.broadcast %4 : vector<1x128xf32> to vector<8x128xf32>
    %10 = arith.addf %8, %9 : vector<8x128xf32>
    %c1_10 = arith.constant 1 : index
    %c0_11 = arith.constant 0 : index
    %c0_12 = arith.constant 0 : index
    %11 = vector.load %arg0[%c1_10, %c0_11, %c0_12] : memref<2x8x8xf32, #tpu.memory_space<vmem>>, vector<1x8x8xf32>
    %12 = vector.shape_cast %11 : vector<1x8x8xf32> to vector<8x8xf32>
    %cst_13 = arith.constant dense<0.000000e+00> : vector<8x128xf32>
    %13 = tpu.matmul %12, %0, %cst_13 {dimension_numbers = #tpu.dot_dimension_numbers<[1], [0], [0], [1], [0, 0, 1, 1], [], []>} : vector<8x8xf32>, vector<8x128xf32>, vector<8x128xf32> -> vector<8x128xf32>
    %14 = vector.broadcast %4 : vector<1x128xf32> to vector<8x128xf32>
    %15 = arith.addf %13, %14 : vector<8x128xf32>
    %cst_14 = arith.constant 0.000000e+00 : f32
    %16 = vector.broadcast %cst_14 : f32 to vector<8x32xf32>
    %cst_15 = arith.constant 0.000000e+00 : f32
    %17 = vector.broadcast %cst_15 : f32 to vector<8x32xf32>
    %cst_16 = arith.constant dense<0.000000e+00> : vector<8x128xf32>
    %18 = tpu.matmul %16, %1, %cst_16 {dimension_numbers = #tpu.dot_dimension_numbers<[1], [0], [0], [1], [0, 0, 1, 1], [], []>} : vector<8x32xf32>, vector<32x128xf32>, vector<8x128xf32> -> vector<8x128xf32>
    %19 = arith.addf %10, %18 : vector<8x128xf32>
    %20 = arith.negf %19 : vector<8x128xf32>
    %21 = math.exp %20 : vector<8x128xf32>
    %cst_17 = arith.constant 1.000000e+00 : f32
    %22 = vector.broadcast %cst_17 : f32 to vector<8x128xf32>
    %23 = arith.addf %22, %21 : vector<8x128xf32>
    %24 = arith.divf %22, %23 : vector<8x128xf32>
    %25 = math.tanh %19 : vector<8x128xf32>
    %26 = vector.extract_strided_slice %24 {offsets = [0, 0], sizes = [8, 32], strides = [1, 1]} : vector<8x128xf32> to vector<8x32xf32>
    %27 = vector.extract_strided_slice %24 {offsets = [0, 32], sizes = [8, 32], strides = [1, 1]} : vector<8x128xf32> to vector<8x32xf32>
    %28 = vector.extract_strided_slice %25 {offsets = [0, 64], sizes = [8, 32], strides = [1, 1]} : vector<8x128xf32> to vector<8x32xf32>
    %29 = vector.extract_strided_slice %24 {offsets = [0, 96], sizes = [8, 32], strides = [1, 1]} : vector<8x128xf32> to vector<8x32xf32>
    %30 = arith.mulf %27, %17 : vector<8x32xf32>
    %31 = arith.mulf %26, %28 : vector<8x32xf32>
    %32 = arith.addf %30, %31 : vector<8x32xf32>
    %33 = math.tanh %32 : vector<8x32xf32>
    %34 = arith.mulf %29, %33 : vector<8x32xf32>
    %cst_18 = arith.constant dense<0.000000e+00> : vector<8x128xf32>
    %35 = tpu.matmul %34, %1, %cst_18 {dimension_numbers = #tpu.dot_dimension_numbers<[1], [0], [0], [1], [0, 0, 1, 1], [], []>} : vector<8x32xf32>, vector<32x128xf32>, vector<8x128xf32> -> vector<8x128xf32>
    %36 = arith.addf %15, %35 : vector<8x128xf32>
    %37 = arith.negf %36 : vector<8x128xf32>
    %38 = math.exp %37 : vector<8x128xf32>
    %cst_19 = arith.constant 1.000000e+00 : f32
    %39 = vector.broadcast %cst_19 : f32 to vector<8x128xf32>
    %40 = arith.addf %39, %38 : vector<8x128xf32>
    %41 = arith.divf %39, %40 : vector<8x128xf32>
    %42 = math.tanh %36 : vector<8x128xf32>
    %43 = vector.extract_strided_slice %41 {offsets = [0, 0], sizes = [8, 32], strides = [1, 1]} : vector<8x128xf32> to vector<8x32xf32>
    %44 = vector.extract_strided_slice %41 {offsets = [0, 32], sizes = [8, 32], strides = [1, 1]} : vector<8x128xf32> to vector<8x32xf32>
    %45 = vector.extract_strided_slice %42 {offsets = [0, 64], sizes = [8, 32], strides = [1, 1]} : vector<8x128xf32> to vector<8x32xf32>
    %46 = vector.extract_strided_slice %41 {offsets = [0, 96], sizes = [8, 32], strides = [1, 1]} : vector<8x128xf32> to vector<8x32xf32>
    %47 = arith.mulf %44, %32 : vector<8x32xf32>
    %48 = arith.mulf %43, %45 : vector<8x32xf32>
    %49 = arith.addf %47, %48 : vector<8x32xf32>
    %50 = math.tanh %49 : vector<8x32xf32>
    %51 = arith.mulf %46, %50 : vector<8x32xf32>
    %cst_20 = arith.constant dense<0.000000e+00> : vector<8x128xf32>
    %52 = tpu.matmul %34, %2, %cst_20 {dimension_numbers = #tpu.dot_dimension_numbers<[1], [0], [0], [1], [0, 0, 1, 1], [], []>} : vector<8x32xf32>, vector<32x128xf32>, vector<8x128xf32> -> vector<8x128xf32>
    %53 = vector.broadcast %5 : vector<1x128xf32> to vector<8x128xf32>
    %54 = arith.addf %52, %53 : vector<8x128xf32>
    %cst_21 = arith.constant dense<0.000000e+00> : vector<8x128xf32>
    %55 = tpu.matmul %51, %2, %cst_21 {dimension_numbers = #tpu.dot_dimension_numbers<[1], [0], [0], [1], [0, 0, 1, 1], [], []>} : vector<8x32xf32>, vector<32x128xf32>, vector<8x128xf32> -> vector<8x128xf32>
    %56 = vector.broadcast %5 : vector<1x128xf32> to vector<8x128xf32>
    %57 = arith.addf %55, %56 : vector<8x128xf32>
    %cst_22 = arith.constant 0.000000e+00 : f32
    %58 = vector.broadcast %cst_22 : f32 to vector<8x32xf32>
    %cst_23 = arith.constant 0.000000e+00 : f32
    %59 = vector.broadcast %cst_23 : f32 to vector<8x32xf32>
    %cst_24 = arith.constant dense<0.000000e+00> : vector<8x128xf32>
    %60 = tpu.matmul %58, %3, %cst_24 {dimension_numbers = #tpu.dot_dimension_numbers<[1], [0], [0], [1], [0, 0, 1, 1], [], []>} : vector<8x32xf32>, vector<32x128xf32>, vector<8x128xf32> -> vector<8x128xf32>
    %61 = arith.addf %54, %60 : vector<8x128xf32>
    %62 = arith.negf %61 : vector<8x128xf32>
    %63 = math.exp %62 : vector<8x128xf32>
    %cst_25 = arith.constant 1.000000e+00 : f32
    %64 = vector.broadcast %cst_25 : f32 to vector<8x128xf32>
    %65 = arith.addf %64, %63 : vector<8x128xf32>
    %66 = arith.divf %64, %65 : vector<8x128xf32>
    %67 = math.tanh %61 : vector<8x128xf32>
    %68 = vector.extract_strided_slice %66 {offsets = [0, 0], sizes = [8, 32], strides = [1, 1]} : vector<8x128xf32> to vector<8x32xf32>
    %69 = vector.extract_strided_slice %66 {offsets = [0, 32], sizes = [8, 32], strides = [1, 1]} : vector<8x128xf32> to vector<8x32xf32>
    %70 = vector.extract_strided_slice %67 {offsets = [0, 64], sizes = [8, 32], strides = [1, 1]} : vector<8x128xf32> to vector<8x32xf32>
    %71 = vector.extract_strided_slice %66 {offsets = [0, 96], sizes = [8, 32], strides = [1, 1]} : vector<8x128xf32> to vector<8x32xf32>
    %72 = arith.mulf %69, %59 : vector<8x32xf32>
    %73 = arith.mulf %68, %70 : vector<8x32xf32>
    %74 = arith.addf %72, %73 : vector<8x32xf32>
    %75 = math.tanh %74 : vector<8x32xf32>
    %76 = arith.mulf %71, %75 : vector<8x32xf32>
    %cst_26 = arith.constant dense<0.000000e+00> : vector<8x128xf32>
    %77 = tpu.matmul %76, %3, %cst_26 {dimension_numbers = #tpu.dot_dimension_numbers<[1], [0], [0], [1], [0, 0, 1, 1], [], []>} : vector<8x32xf32>, vector<32x128xf32>, vector<8x128xf32> -> vector<8x128xf32>
    %78 = arith.addf %57, %77 : vector<8x128xf32>
    %79 = arith.negf %78 : vector<8x128xf32>
    %80 = math.exp %79 : vector<8x128xf32>
    %cst_27 = arith.constant 1.000000e+00 : f32
    %81 = vector.broadcast %cst_27 : f32 to vector<8x128xf32>
    %82 = arith.addf %81, %80 : vector<8x128xf32>
    %83 = arith.divf %81, %82 : vector<8x128xf32>
    %84 = math.tanh %78 : vector<8x128xf32>
    %85 = vector.extract_strided_slice %83 {offsets = [0, 0], sizes = [8, 32], strides = [1, 1]} : vector<8x128xf32> to vector<8x32xf32>
    %86 = vector.extract_strided_slice %83 {offsets = [0, 32], sizes = [8, 32], strides = [1, 1]} : vector<8x128xf32> to vector<8x32xf32>
    %87 = vector.extract_strided_slice %84 {offsets = [0, 64], sizes = [8, 32], strides = [1, 1]} : vector<8x128xf32> to vector<8x32xf32>
    %88 = vector.extract_strided_slice %83 {offsets = [0, 96], sizes = [8, 32], strides = [1, 1]} : vector<8x128xf32> to vector<8x32xf32>
    %89 = arith.mulf %86, %74 : vector<8x32xf32>
    %90 = arith.mulf %85, %87 : vector<8x32xf32>
    %91 = arith.addf %89, %90 : vector<8x32xf32>
    %92 = math.tanh %91 : vector<8x32xf32>
    %93 = arith.mulf %88, %92 : vector<8x32xf32>
    %94 = vector.extract_strided_slice %93 {offsets = [6, 0], sizes = [2, 32], strides = [1, 1]} : vector<8x32xf32> to vector<2x32xf32>
    %c2 = arith.constant 2 : index
    %c0_28 = arith.constant 0 : index
    %95 = vector.load %arg2[%c2, %c0_28] : memref<4x128xf32, #tpu.memory_space<vmem>>, vector<1x32xf32>
    %c3 = arith.constant 3 : index
    %c0_29 = arith.constant 0 : index
    %96 = vector.load %arg2[%c3, %c0_29] : memref<4x128xf32, #tpu.memory_space<vmem>>, vector<1x1xf32>
    %97 = vector.broadcast %95 : vector<1x32xf32> to vector<2x32xf32>
    %98 = arith.mulf %94, %97 : vector<2x32xf32>
    %cst_30 = arith.constant dense<0.000000e+00> : vector<2xf32>
    %99 = vector.multi_reduction <add>, %98, %cst_30 [1] : vector<2x32xf32> to vector<2xf32>
    %100 = vector.shape_cast %99 : vector<2xf32> to vector<2x1xf32>
    %101 = vector.broadcast %96 : vector<1x1xf32> to vector<2x1xf32>
    %102 = arith.addf %100, %101 : vector<2x1xf32>
    %c0_31 = arith.constant 0 : index
    %c0_32 = arith.constant 0 : index
    %103 = vector.load %arg3[%c0_31, %c0_32] : memref<2x1xf32, #tpu.memory_space<vmem>>, vector<2x1xf32>
    tpu.vector_store %arg3[%c0_31, %c0_32], %102 {strides = array<i32>} : memref<2x1xf32, #tpu.memory_space<vmem>>, vector<2x1xf32>,
    return
  }
}

</mosaic_0001>

<bundles_post_ra>
// kernel: tpu_custom_call.1
= control target key start
LH: loop header
LB: loop body
LE: loop exit
PB: predicated region body
PF: predicated region fallthrough
CT: control target
= control target key end

     0   :  { %8 = vsyncpa [#allocation3], 0  ;;  %s1159_s0 = inlined_call_operand.hbm [shape: f32[2,8,8], index: 0, kind: input, shape index: {}]   ;;  %s1160_s1 = inlined_call_operand.hbm [shape: f32[104,128], index: 1, kind: input, shape index: {}]   ;;  %s1161_s2 = inlined_call_operand.hbm [shape: f32[4,128], index: 2, kind: input, shape index: {}]   ;;  %s1162_s3 = inlined_call_operand.vmem [shape: f32[2,1], index: 3, kind: output, shape index: {}]  }
   0x1   :  { %9 = vsyncpa [#allocation5], 0  ;;  %s1027_s12 = smov [#allocation4]   ;;  %s1028_s14 = smov [#allocation2]  }
   0x2   :  { %s27_s13 = sshll.u32 %s1027_s12, 4  ;;  %s15_s15 = sshll.u32 %s1028_s14, 4  ;;  %s28_s13 = int_to_ptr.vmem [resolvable:$true] %s27_s13  ;;  %s16_s15 = int_to_ptr.vmem [resolvable:$true] %s15_s15 }
   0x3   :  { %s971_s16 = scalar_lea.vmem %s28_s13, 1664  ;;  %p976_p1 = scmp.lt.s32.totalorder %s28_s13, %s28_s13 }
   0x4   :  { %p972_p0 = scmp.ne.s32.totalorder %s28_s13, %s971_s16  ;;  %p977_p2 = scmp.lt.s32.totalorder %s971_s16, %s971_s16 }
   0x6   :  { %p978_p3 = por %p977_p2, %p976_p1 }
   0x8   :  { %p979_p4 = pnand %p978_p3, %p972_p0 }
   0xa   :  { %982 = shalt.err (!%p979_p4)
}
   0xb   :  { %s1029_s17 = smov 128   ;;  %s1030_s18 = smov 8  }
   0xc   :  { %33 = dma.hbm_to_vmem [thread:$0]  %s1160_s1, 1664, %s28_s13, [#allocation5], %s1029_s17, %s1029_s17, %s1030_s18  }
   0xd   :  { %s991_s21 = scalar_lea.vmem %s16_s15, 256  ;;  %p996_p6 = scmp.lt.s32.totalorder %s16_s15, %s16_s15 }
   0xe   :  { %p992_p5 = scmp.ne.s32.totalorder %s16_s15, %s991_s21  ;;  %p997_p7 = scmp.lt.s32.totalorder %s991_s21, %s991_s21 }
  0x10   :  { %p998_p8 = por %p997_p7, %p996_p6 }
  0x12   :  { %p999_p9 = pnand %p998_p8, %p992_p5 }
  0x14   :  { %1002 = shalt.err (!%p999_p9)
}
  0x15   :  { %21 = dma.hbm_to_vmem [thread:$0]  %s1159_s0, 256, %s16_s15, [#allocation3], %s1029_s17, %s1029_s17, %s1030_s18  }
  0x16   :  { %s1031_s24 = smov [#allocation6]  }
  0x17   :  { %s40_s25 = sshll.u32 %s1031_s24, 4  ;;  %s41_s25 = int_to_ptr.vmem [resolvable:$true] %s40_s25 }
  0x18   :  { %s1011_s26 = scalar_lea.vmem %s41_s25, 64  ;;  %p1016_p11 = scmp.lt.s32.totalorder %s41_s25, %s41_s25 }
  0x19   :  { %p1012_p10 = scmp.ne.s32.totalorder %s41_s25, %s1011_s26  ;;  %p1017_p12 = scmp.lt.s32.totalorder %s1011_s26, %s1011_s26 }
  0x1b   :  { %p1018_p13 = por %p1017_p12, %p1016_p11 }
  0x1d   :  { %p1019_p0 = pnand %p1018_p13, %p1012_p10 }
  0x1f   :  { %1022 = shalt.err (!%p1019_p0)
}
  0x20   :  { %43 = dma.hbm_to_vmem [thread:$0]  %s1161_s2, 64, %s41_s25, [#allocation5]  }
  0x21   :  { %1023 = dma.done.wait [#allocation3], 256  }
  0x22   :  { %1024 = vsyncadd [#allocation3], 4294967040 }
  0x23   :  { %1025 = dma.done.wait [#allocation5], 1728  }
  0x24   :  { %1026 = vsyncadd [#allocation5], 4294965568  ;;  %v1032_v0 = vmov 0.0   ;;  %vm1033_vm0 = vmmov 0   ;;  %vm73_vm1 = vcmask 64512   ;;  %v53_v1 = vld [vmem:[#allocation4] sm:$0xff] }
  0x25   :  { %845 = vmatprep.subr.mxu0 %v1032_v0  ;;  %847 = vmatprep.mubr.msk.f32.mxu0 %vm1033_vm0, %v1032_v0  ;;  %v68_v2 = vld [vmem:[#allocation2] sm:$0xff]  ;;  %v57_v3 = vld [vmem:[#allocation4 + $0x20] sm:$0xff]  ;;  %v56_v4 = vld [vmem:[#allocation4 + $0x18] sm:$0xff]  ;;  %s1034_s0 = smov 64   ;;  %s1035_s2 = smov 32   ;;  %vm222_vm2 = vcmask 261120  }
  0x26   :  { %850 = vmatprep.subr.mxu1 %v1032_v0  ;;  %852 = vmatprep.mubr.msk.f32.mxu1 %vm1033_vm0, %v1032_v0  ;;  %v55_v5 = vld [vmem:[#allocation4 + $0x10] sm:$0xff]  ;;  %v54_v6 = vld [vmem:[#allocation4 + $0x8] sm:$0xff]  ;;  %v148_v24 = vld [vmem:[#allocation2 + $0x8] sm:$0xff]  ;;  %s1036_s28 = smov 96   ;;  %vm780_vm3 = vcmask 261126   ;;  %vm789_vm4 = vcmask 7174  }
  0x27   :  { %846 = vmatpush3.msra.mxu0 %v53_v1  ;;  %851 = vmatpush3.msra.mxu1 %v53_v1  ;;  %v1084_v9 = vld [vmem:[#allocation6] ss:$0 sm:$0xff]  ;;  %v61_v25 = vld [vmem:[#allocation4 + $0x40] sm:$0xff]  ;;  %v60_v26 = vld [vmem:[#allocation4 + $0x38] sm:$0xff] }
  0x28   :  { %848 = vmatmul.mubr.msk.f32.vlgmr.msra.gmra.mxu0 %vm73_vm1, %v68_v2  ;;  %855 = vmatprep.subr.mxu0 %v1032_v0  ;;  %v59_v27 = vld [vmem:[#allocation4 + $0x30] sm:$0xff]  ;;  %v58_v28 = vld [vmem:[#allocation4 + $0x28] sm:$0xff]  ;;  %v1105_v34 = vld [vmem:[#allocation4 + $0x60] sm:$0xff] }
  0x29   :  { %856 = vmatpush3.msra.mxu0 %v57_v3  ;;  %863 = vmatprep.mubr.msk.f32.mxu0 %vm1033_vm0, %v1032_v0  ;;  %v1109_v36 = vld [vmem:[#allocation4 + $0x58] sm:$0xff]  ;;  %v1115_v37 = vld [vmem:[#allocation4 + $0x50] sm:$0xff]  ;;  %v1120_v38 = vld [vmem:[#allocation4 + $0x48] sm:$0xff] }
  0x2a   :  { %857 = vmatprep.subr.mxu0 %v1032_v0  ;;  %866 = vmatprep.subr.mxu1 %v1032_v0  ;;  %v803_v45 = vld [vmem:[#allocation6 + $0x1] ss:$0 sm:$0xff] }
  0x2b   :  { %858 = vmatpush3.msra.mxu0 %v56_v4  ;;  %853 = vmatmul.mubr.msk.f32.vlgmr.msra.gmra.mxu1 %vm73_vm1, %v148_v24 }
  0x2c   :  { %859 = vmatprep.subr.mxu0 %v1032_v0  ;;  %867 = vmatpush3.msra.mxu1 %v57_v3 }
  0x2d   :  { %860 = vmatpush3.msra.mxu0 %v55_v5  ;;  %868 = vmatprep.subr.mxu1 %v1032_v0 }
  0x2e   :  { %861 = vmatprep.subr.mxu0 %v1032_v0  ;;  %869 = vmatpush3.msra.mxu1 %v56_v4 }
  0x2f   :  { %862 = vmatpush3.msra.mxu0 %v54_v6  ;;  %870 = vmatprep.subr.mxu1 %v1032_v0 }
  0x30   :  { %864 = vmatmul.mubr.f32.vlgmr.msra.gmra.mxu0 %v1032_v0  ;;  %877 = vmatprep.subr.mxu0 %v1032_v0 }
  0x31   :  { %885 = vmatprep.mubr.msk.f32.mxu0 %vm1033_vm0, %v1032_v0  ;;  %878 = vmatpush3.msra.mxu0 %v61_v25 }
  0x32   :  { %879 = vmatprep.subr.mxu0 %v1032_v0  ;;  %871 = vmatpush3.msra.mxu1 %v55_v5 }
  0x33   :  { %880 = vmatpush3.msra.mxu0 %v60_v26  ;;  %872 = vmatprep.subr.mxu1 %v1032_v0 }
  0x34   :  { %881 = vmatprep.subr.mxu0 %v1032_v0  ;;  %873 = vmatpush3.msra.mxu1 %v54_v6 }
  0x35   :  { %882 = vmatpush3.msra.mxu0 %v59_v27  ;;  %874 = vmatprep.mubr.msk.f32.mxu1 %vm1033_vm0, %v1032_v0 }
  0x36   :  { %883 = vmatprep.subr.mxu0 %v1032_v0  ;;  %888 = vmatprep.subr.mxu1 %v1032_v0 }
  0x37   :  { %884 = vmatpush3.msra.mxu0 %v58_v28 }
  0x38   :  { %899 = vmatprep.subr.mxu0 %v1032_v0 }
  0xe8   :  { %v143_v7 = vpop.f32.mrf.mxu0 }
  0xe9   :  { %v144_v10 = vadd.f32 %v1084_v9, %v143_v7 }
  0xea   :  { %v849_v8 = vpop.f32.mrf.mxu0 }
  0xeb   :  { %v218_v32 = vpop.f32.mrf.mxu1 }
  0xec   :  { %v219_v39 = vadd.f32 %v1084_v9, %v218_v32 }
  0xed   :  { %v854_v33 = vpop.f32.mrf.mxu1 }
  0xf0   :  { %v292_v11 = vpop.f32.mrf.mxu0 }
  0xf1   :  { %v296_v12 = vadd.f32 %v292_v11, %v144_v10 }
  0xf2   :  { %v865_v13 = vpop.f32.mrf.mxu0 }
  0xf3   :  { %931 = vtanh.f32 %v296_v12  ;;  %v800_v15 = vmul.f32 -1.442695, %v296_v12 }
  0xf5   :  { %933 = vpow2.f32 %v800_v15 }
 0x100   :  { %v932_v14 = vpop.eup %931 }
 0x101   :  { %306 = vrot.lane.b32.xlu0 %v932_v14, %s1034_s0 }
 0x102   :  { %v934_v16 = vpop.eup %933 }
 0x103   :  { %v300_v17 = vadd.f32 1.0, %v934_v16 }
 0x105   :  { %935 = vrcp.f32 %v300_v17 }
 0x112   :  { %v936_v18 = vpop.eup %935 }
 0x113   :  { %v304_v21 = vmul.f32 0.0, %v936_v18 }
 0x173   :  { %v307_v19 = vpop.permute.xlu0 %306 }
 0x174   :  { %v309_v20 = vmul.f32 %v936_v18, %v307_v19 }
 0x176   :  { %311 = vrot.lane.b32.xlu0 %v309_v20, %s1035_s2 }
 0x1e8   :  { %v312_v22 = vpop.permute.xlu0 %311 }
 0x1e9   :  { %v1089_v23 = vadd.f32 %v312_v22, %v304_v21 }
 0x1eb   :  { %937 = vtanh.f32 %v1089_v23 }
 0x1f8   :  { %v938_v29 = vpop.eup %937 }
 0x1f9   :  { %317 = vrot.lane.b32.xlu1 %v938_v29, %s1034_s0 }
 0x26b   :  { %v318_v30 = vpop.permute.xlu1 %317 }
 0x26c   :  { %v320_v31 = vmul.f32 %v936_v18, %v318_v30 }
 0x26e   :  { %322 = vrot.lane.b32.xlu1 %v320_v31, %s1035_s2 }
 0x2e0   :  { %v323_v35 = vpop.permute.xlu1 %322 }
 0x2e1   :  { %875 = vmatmul.mubr.msk.f32.vlgmr.msra.gmra.mxu1 %vm222_vm2, %v323_v35  ;;  %886 = vmatmul.mubr.msk.f32.vlgmr.msra.gmra.mxu0 %vm222_vm2, %v323_v35 }
 0x2e2   :  { %900 = vmatpush3.msra.mxu0 %v1105_v34  ;;  %907 = vmatprep.mubr.msk.f32.mxu0 %vm1033_vm0, %v1032_v0 }
 0x2e3   :  { %901 = vmatprep.subr.mxu0 %v1032_v0  ;;  %889 = vmatpush3.msra.mxu1 %v61_v25 }
 0x2e4   :  { %902 = vmatpush3.msra.mxu0 %v1109_v36  ;;  %890 = vmatprep.subr.mxu1 %v1032_v0 }
 0x2e5   :  { %903 = vmatprep.subr.mxu0 %v1032_v0  ;;  %891 = vmatpush3.msra.mxu1 %v60_v26 }
 0x2e6   :  { %904 = vmatpush3.msra.mxu0 %v1115_v37  ;;  %892 = vmatprep.subr.mxu1 %v1032_v0 }
 0x2e7   :  { %905 = vmatprep.subr.mxu0 %v1032_v0  ;;  %893 = vmatpush3.msra.mxu1 %v59_v27  ;;  %v809_v27 = vld [vmem:[#allocation6 + $0x2] ss:$0 sm:$0xff] }
 0x2e8   :  { %906 = vmatpush3.msra.mxu0 %v1120_v38  ;;  %894 = vmatprep.subr.mxu1 %v1032_v0 }
 0x2e9   :  { %908 = vmatmul.mubr.f32.vlgmr.msra.gmra.mxu0 %v1032_v0  ;;  %895 = vmatpush3.msra.mxu1 %v58_v28 }
 0x2ea   :  { %896 = vmatprep.mubr.msk.f32.mxu1 %vm1033_vm0, %v1032_v0  ;;  %910 = vmatprep.subr.mxu1 %v1032_v0 }
 0x3a1   :  { %v392_v40 = vpop.f32.mrf.mxu1  ;;  %v491_v41 = vpop.f32.mrf.mxu0 }
 0x3a2   :  { %v396_v42 = vadd.f32 %v392_v40, %v219_v39  ;;  %v492_v46 = vadd.f32 %v803_v45, %v491_v41 }
 0x3a3   :  { %v876_v43 = vpop.f32.mrf.mxu1  ;;  %v887_v44 = vpop.f32.mrf.mxu0 }
 0x3a4   :  { %939 = vtanh.f32 %v396_v42  ;;  %v802_v52 = vmul.f32 -1.442695, %v396_v42 }
 0x3a9   :  { %v636_v47 = vpop.f32.mrf.mxu0 }
 0x3aa   :  { %v640_v48 = vadd.f32 %v636_v47, %v492_v46 }
 0x3ab   :  { %v909_v49 = vpop.f32.mrf.mxu0 }
 0x3ac   :  { %941 = vtanh.f32 %v640_v48  ;;  %v806_v53 = vmul.f32 -1.442695, %v640_v48 }
 0x3ad   :  { %943 = vpow2.f32 %v802_v52 }
 0x3ae   :  { %945 = vpow2.f32 %v806_v53 }
 0x3b1   :  { %v940_v50 = vpop.eup %939 }
 0x3b2   :  { %406 = vrot.lane.b32.xlu0 %v940_v50, %s1034_s0 }
 0x3b9   :  { %v942_v51 = vpop.eup %941 }
 0x3ba   :  { %650 = vrot.lane.b32.xlu1 %v942_v51, %s1034_s0  ;;  %v944_v54 = vpop.eup %943 }
 0x3bb   :  { %v400_v55 = vadd.f32 1.0, %v944_v54  ;;  %v946_v56 = vpop.eup %945 }
 0x3bc   :  { %v644_v57 = vadd.f32 1.0, %v946_v56 }
 0x3bd   :  { %947 = vrcp.f32 %v400_v55 }
 0x3be   :  { %949 = vrcp.f32 %v644_v57 }
 0x3ca   :  { %v948_v58 = vpop.eup %947 }
 0x3cb   :  { %v950_v61 = vpop.eup %949  ;;  %v404_v1 = vmul.f32 %v948_v58, %v1089_v23 }
 0x3cc   :  { %v648_v4 = vmul.f32 0.0, %v950_v61 }
 0x424   :  { %v407_v59 = vpop.permute.xlu0 %406 }
 0x425   :  { %v409_v60 = vmul.f32 %v948_v58, %v407_v59 }
 0x427   :  { %411 = vrot.lane.b32.xlu0 %v409_v60, %s1035_s2 }
 0x42c   :  { %v651_v62 = vpop.permute.xlu1 %650 }
 0x42d   :  { %v653_v63 = vmul.f32 %v950_v61, %v651_v62 }
 0x42f   :  { %655 = vrot.lane.b32.xlu1 %v653_v63, %s1035_s2 }
 0x499   :  { %v412_v2 = vpop.permute.xlu0 %411 }
 0x49a   :  { %v414_v3 = vadd.f32 %v412_v2, %v404_v1 }
 0x49c   :  { %951 = vtanh.f32 %v414_v3 }
 0x4a1   :  { %v656_v5 = vpop.permute.xlu1 %655 }
 0x4a2   :  { %v658_v6 = vadd.f32 %v656_v5, %v648_v4 }
 0x4a4   :  { %953 = vtanh.f32 %v658_v6 }
 0x4a9   :  { %v952_v7 = vpop.eup %951 }
 0x4aa   :  { %417 = vrot.lane.b32.xlu0 %v952_v7, %s1034_s0 }
 0x4b1   :  { %v954_v8 = vpop.eup %953 }
 0x4b2   :  { %661 = vrot.lane.b32.xlu1 %v954_v8, %s1034_s0 }
 0x51c   :  { %v418_v9 = vpop.permute.xlu0 %417 }
 0x51d   :  { %v420_v10 = vmul.f32 %v948_v58, %v418_v9 }
 0x51f   :  { %496 = vrot.lane.b32.xlu0 %v420_v10, %s1035_s2 }
 0x524   :  { %v662_v11 = vpop.permute.xlu1 %661 }
 0x525   :  { %v664_v12 = vmul.f32 %v950_v61, %v662_v11 }
 0x527   :  { %666 = vrot.lane.b32.xlu1 %v664_v12, %s1035_s2 }
 0x591   :  { %v497_v13 = vpop.permute.xlu0 %496 }
 0x592   :  { %897 = vmatmul.mubr.msk.f32.vlgmr.msra.gmra.mxu1 %vm222_vm2, %v497_v13 }
 0x593   :  { %911 = vmatpush3.msra.mxu1 %v1105_v34  ;;  %918 = vmatprep.mubr.msk.f32.mxu1 %vm1033_vm0, %v1032_v0 }
 0x594   :  { %912 = vmatprep.subr.mxu1 %v1032_v0 }
 0x595   :  { %913 = vmatpush3.msra.mxu1 %v1109_v36 }
 0x596   :  { %914 = vmatprep.subr.mxu1 %v1032_v0 }
 0x597   :  { %915 = vmatpush3.msra.mxu1 %v1115_v37 }
 0x598   :  { %916 = vmatprep.subr.mxu1 %v1032_v0 }
 0x599   :  { %917 = vmatpush3.msra.mxu1 %v1120_v38  ;;  %v667_v14 = vpop.permute.xlu1 %666  ;;  %v810_v38 = vld [vmem:[#allocation6 + $0x3] ss:$0 sm:$0xff] }
 0x59a   :  { %919 = vmatmul.mubr.msk.f32.vlgmr.msra.gmra.mxu1 %vm222_vm2, %v667_v14 }
 0x652   :  { %v566_v15 = vpop.f32.mrf.mxu1 }
 0x653   :  { %v567_v17 = vadd.f32 %v803_v45, %v566_v15 }
 0x654   :  { %v898_v16 = vpop.f32.mrf.mxu1 }
 0x65a   :  { %v736_v18 = vpop.f32.mrf.mxu1 }
 0x65b   :  { %v740_v19 = vadd.f32 %v736_v18, %v567_v17 }
 0x65c   :  { %v920_v20 = vpop.f32.mrf.mxu1 }
 0x65d   :  { %955 = vtanh.f32 %v740_v19  ;;  %v808_v22 = vmul.f32 -1.442695, %v740_v19 }
 0x65f   :  { %957 = vpow2.f32 %v808_v22 }
 0x66a   :  { %v956_v21 = vpop.eup %955 }
 0x66b   :  { %750 = vrot.lane.b32.xlu0 %v956_v21, %s1034_s0 }
 0x66c   :  { %v958_v23 = vpop.eup %957 }
 0x66d   :  { %v744_v24 = vadd.f32 1.0, %v958_v23 }
 0x66f   :  { %959 = vrcp.f32 %v744_v24 }
 0x67c   :  { %v960_v0 = vpop.eup %959 }
 0x67d   :  { %v748_v28 = vmul.f32 %v960_v0, %v658_v6 }
 0x6dd   :  { %v751_v25 = vpop.permute.xlu0 %750 }
 0x6de   :  { %v753_v26 = vmul.f32 %v960_v0, %v751_v25 }
 0x6e0   :  { %755 = vrot.lane.b32.xlu1 %v753_v26, %s1035_s2 }
 0x6e4   :  { %772 = vrot.lane.b32.xlu1 %v809_v27, %s1036_s28 }
 0x752   :  { %v756_v29 = vpop.permute.xlu1 %755 }
 0x753   :  { %v758_v30 = vadd.f32 %v756_v29, %v748_v28 }
 0x755   :  { %961 = vtanh.f32 %v758_v30 }
 0x756   :  { %v773_v33 = vpop.permute.xlu1 %772 }
 0x762   :  { %v962_v31 = vpop.eup %961 }
 0x763   :  { %761 = vrot.lane.b32.xlu0 %v962_v31, %s1034_s0 }
 0x7d5   :  { %v762_v32 = vpop.permute.xlu0 %761 }
 0x7d6   :  { %v764_v34 = vmul.f32 %v960_v0, %v762_v32 }
 0x7d8   :  { %v775_v35 = vmul.f32 %v773_v33, %v764_v34 }
 0x7da   :  { %777 = vrot.lane.b32.xlu0 %v775_v35, %s1035_s2 }
 0x84c   :  { %v778_v36 = vpop.permute.xlu0 %777 }
 0x84d   :  { %v781_v37 = vsel %vm780_vm3, %v778_v36, 0.0 }
 0x84e   :  { %782 = vadd.xlane.f32.xlu1 %v781_v37 }
 0x8d7   :  { %v783_v39 = vpop.xlane.xlu1 %782 }
 0x8d8   :  { %v788_v40 = vadd.f32 %v810_v38, %v783_v39 }
 0x8da   :  { %790 = vst.msk [vmem:[%s1162_s3 - $0x6] sm:$0xc0] %vm789_vm4, %v788_v40 }
 0x8db   :  { %795 = vsyncpa [#allocation3], 1 }
 0x8dc   :  { %796 = vsyncpa [#allocation5], 1 }

</bundles_post_ra>
